<compile_context>
chip_gen: v7x
topology: tpu7x:2x2x1
jax: 0.10.0
libtpu: 0.0.40
codegen_flags: <defaults>
</compile_context>

<pallas_src>
from functools import partial

import jax
import jax.numpy as jnp
from jax.experimental import pallas as pl
from jax.experimental.pallas import tpu as pltpu


def _round_up(x, m):
    return (x + m - 1) // m * m


def _mlpwx_fused_kernel(w_ref, b_ref, x_ref, o_ref):
    # w_ref: (dim_in, dout_pad) f32 -- resident across the batch grid
    # b_ref: (1, dout_pad)      f32 -- resident
    # x_ref: (block_b, dim_in)  f32 -- streamed batch tile (natural layout)
    # o_ref: (block_b, dout_pad) f32
    y = jnp.dot(x_ref[...], w_ref[...], preferred_element_type=jnp.float32)
    o_ref[...] = (y + b_ref[...]).astype(o_ref.dtype)


def prepare_params(w1, b1, w2, b2):
    """One-time weight prep: collapse the two Linear layers and pad dim_out.

    w1: (dim_in, dim_hidden), b1: (1, dim_hidden)    (weights stored as W.T)
    w2: (dim_hidden, dim_out), b2: (1, dim_out)
    Returns (w_p, b_p, dim_out) with w_p: (dim_in, dout_pad), b_p: (1, dout_pad).
    """
    w_eff = (w1 @ w2).astype(jnp.float32)            # (dim_in, dim_out)
    b_eff = (b1 @ w2 + b2).astype(jnp.float32)       # (1, dim_out)
    dim_in, dim_out = w_eff.shape
    dout_pad = _round_up(max(dim_out, 8), 8)         # f32 sublane multiple
    w_p = jnp.zeros((dim_in, dout_pad), jnp.float32).at[:, :dim_out].set(w_eff)
    b_p = jnp.zeros((1, dout_pad), jnp.float32).at[:, :dim_out].set(b_eff)
    return w_p, b_p, dim_out


def _auto_block_b(batch):
    # >=2 grid steps when the batch is big enough so both v7x TensorCores get
    # work; a single step otherwise (minimal per-step overhead on v5e/v6e).
    if batch >= 256:
        return _round_up(-(-batch // 2), 8)
    return _round_up(max(batch, 8), 8)


@partial(jax.jit, static_argnames=("dim_out", "block_b"))
def mlpwx_forward(x, w_p, b_p, *, dim_out, block_b=None):
    """MLPWX forward (eval mode). x: (B, dim_in) f32 -> (B, dim_out) f32."""
    B, dim_in = x.shape
    dout_pad = w_p.shape[1]
    if block_b is None:
        block_b = _auto_block_b(B)
    assert block_b % 8 == 0, "batch tile must be a multiple of 8 sublanes"

    b_pad = _round_up(B, block_b)
    if b_pad != B:
        x = jnp.pad(x, ((0, b_pad - B), (0, 0)))

    grid = (b_pad // block_b,)
    out = pl.pallas_call(
        _mlpwx_fused_kernel,
        out_shape=jax.ShapeDtypeStruct((b_pad, dout_pad), x.dtype),
        grid=grid,
        in_specs=[
            pl.BlockSpec((dim_in, dout_pad), lambda i: (0, 0)),   # resident W_eff
            pl.BlockSpec((1, dout_pad), lambda i: (0, 0)),        # resident bias
            pl.BlockSpec((block_b, dim_in), lambda i: (i, 0)),    # streamed x tile
        ],
        out_specs=pl.BlockSpec((block_b, dout_pad), lambda i: (i, 0)),
        compiler_params=pltpu.CompilerParams(
            dimension_semantics=("parallel",)),
    )(w_p, b_p, x)

    # Drop batch / dim_out padding (stays under the same jit as the kernel).
    return out[:B, :dim_out]


def init_params(key, dim_in=14, dim_hidden=64, dim_out=1):
    """Deterministic PyTorch-style nn.Linear init: U(-1/sqrt(fan_in), 1/sqrt(fan_in))."""
    k1, k2, k3, k4 = jax.random.split(key, 4)
    bnd1 = 1.0 / jnp.sqrt(dim_in)
    bnd2 = 1.0 / jnp.sqrt(dim_hidden)
    # stored as (in_features, out_features) == W.T of the PyTorch (out, in) weight
    w1 = jax.random.uniform(k1, (dim_in, dim_hidden), jnp.float32, -bnd1, bnd1)
    b1 = jax.random.uniform(k2, (1, dim_hidden), jnp.float32, -bnd1, bnd1)
    w2 = jax.random.uniform(k3, (dim_hidden, dim_out), jnp.float32, -bnd2, bnd2)
    b2 = jax.random.uniform(k4, (1, dim_out), jnp.float32, -bnd2, bnd2)
    return w1, b1, w2, b2


if __name__ == "__main__":
    dim_in, dim_hidden, dim_out = 14, 64, 1
    batch = 256                       # small, but grid=(2,) exercises the pipeline

    key = jax.random.PRNGKey(0)
    kx, kp = jax.random.split(key)
    x = jax.random.normal(kx, (batch, dim_in), jnp.float32)
    w1, b1, w2, b2 = init_params(kp, dim_in, dim_hidden, dim_out)

    # One-time weight prep (hoisted out of the per-batch path).
    w_p, b_p, dout = prepare_params(w1, b1, w2, b2)

    y = mlpwx_forward(x, w_p, b_p, dim_out=dout)
    y = jax.block_until_ready(y)
    assert y.shape == (batch, dim_out)

    # Pure-JAX references (dropout = identity in eval mode).
    y_fused_ref = x @ (w1 @ w2) + (b1 @ w2 + b2)      # what the kernel computes
    y_f32_ref = (x @ w1 + b1) @ w2 + b2               # original two-layer forward

    assert jnp.allclose(y, y_fused_ref, atol=2e-2, rtol=2e-2)
    assert jnp.allclose(y, y_f32_ref, atol=2e-2, rtol=2e-2)
    print("KERNEL_OK")
</pallas_src>

<mosaic_0001>
module attributes {stable_mosaic.version = 11 : i64} {
  func.func @_mlpwx_fused_kernel(%arg0: i32, %arg1: memref<14x8xf32, #tpu.memory_space<vmem>>, %arg2: memref<1x8xf32, #tpu.memory_space<vmem>>, %arg3: memref<128x14xf32, #tpu.memory_space<vmem>>, %arg4: memref<128x8xf32, #tpu.memory_space<vmem>>) attributes {dimension_semantics = [#tpu.dimension_semantics<parallel>], iteration_bounds = array<i64: 2>, scalar_prefetch = 0 : i64, scratch_operands = 0 : i64, tpu.core_type = #tpu.core_type<tc>, window_params = [{pipeline_mode = #tpu.pipeline_mode<synchronous>, transform_indices = @transform_0, window_bounds = array<i64: 14, 8>}, {pipeline_mode = #tpu.pipeline_mode<synchronous>, transform_indices = @transform_1, window_bounds = array<i64: 1, 8>}, {transform_indices = @transform_2, window_bounds = array<i64: 128, 14>}, {transform_indices = @transform_3, window_bounds = array<i64: 128, 8>}]} {
    %c0 = arith.constant 0 : index
    %c0_0 = arith.constant 0 : index
    %0 = vector.load %arg3[%c0, %c0_0] : memref<128x14xf32, #tpu.memory_space<vmem>>, vector<128x14xf32>
    %c0_1 = arith.constant 0 : index
    %c0_2 = arith.constant 0 : index
    %1 = vector.load %arg1[%c0_1, %c0_2] : memref<14x8xf32, #tpu.memory_space<vmem>>, vector<14x8xf32>
    %cst = arith.constant dense<0.000000e+00> : vector<128x8xf32>
    %2 = tpu.matmul %0, %1, %cst {dimension_numbers = #tpu.dot_dimension_numbers<[1], [0], [0], [1], [0, 0, 1, 1], [], []>} : vector<128x14xf32>, vector<14x8xf32>, vector<128x8xf32> -> vector<128x8xf32>
    %c0_3 = arith.constant 0 : index
    %c0_4 = arith.constant 0 : index
    %3 = vector.load %arg2[%c0_3, %c0_4] : memref<1x8xf32, #tpu.memory_space<vmem>>, vector<1x8xf32>
    %4 = vector.broadcast %3 : vector<1x8xf32> to vector<128x8xf32>
    %5 = arith.addf %2, %4 : vector<128x8xf32>
    %c0_5 = arith.constant 0 : index
    %c0_6 = arith.constant 0 : index
    %6 = vector.load %arg4[%c0_5, %c0_6] : memref<128x8xf32, #tpu.memory_space<vmem>>, vector<128x8xf32>
    tpu.vector_store %arg4[%c0_5, %c0_6], %5 {strides = array<i32>} : memref<128x8xf32, #tpu.memory_space<vmem>>, vector<128x8xf32>,
    return
  }
  func.func @transform_0(%arg0: i32) -> (i32, i32) {
    %c0_i32 = arith.constant 0 : i32
    %c0_i32_0 = arith.constant 0 : i32
    %c0_i32_1 = arith.constant 0 : i32
    return %c0_i32, %c0_i32_0 : i32, i32
  }
  func.func @transform_1(%arg0: i32) -> (i32, i32) {
    %c0_i32 = arith.constant 0 : i32
    %c0_i32_0 = arith.constant 0 : i32
    %c0_i32_1 = arith.constant 0 : i32
    return %c0_i32, %c0_i32_0 : i32, i32
  }
  func.func @transform_2(%arg0: i32) -> (i32, i32) {
    %c0_i32 = arith.constant 0 : i32
    %c0_i32_0 = arith.constant 0 : i32
    return %arg0, %c0_i32 : i32, i32
  }
  func.func @transform_3(%arg0: i32) -> (i32, i32) {
    %c0_i32 = arith.constant 0 : i32
    %c0_i32_0 = arith.constant 0 : i32
    return %arg0, %c0_i32 : i32, i32
  }
}

</mosaic_0001>

<bundles_post_ra>
// kernel: mlpwx_forward.1
= control target key start
LH: loop header
LB: loop body
LE: loop exit
PB: predicated region body
PF: predicated region fallthrough
CT: control target
= control target key end

     0   :  { %s591_s12 = smov 0   ;;  %s674_s0 = inlined_call_operand.vmem [shape: f32[14,8], index: 0, kind: input, shape index: {}]   ;;  %s675_s1 = inlined_call_operand.vmem [shape: f32[1,8], index: 1, kind: input, shape index: {}]   ;;  %s676_s2 = inlined_call_operand.vmem [shape: f32[256,14], index: 2, kind: input, shape index: {}]   ;;  %s677_s3 = inlined_call_operand.vmem [shape: f32[256,8], index: 3, kind: output, shape index: {}]  }
   0x1 LB: > { %s470_s13 = sadd.s32 4294967295, %s568_s12   ;;  %p474_p0 = scmp.ge.s32.totalorder %s568_s12, 1  ;;  %s568_s12 = sphi %s591_s12, %s13_s12  }
   0x2   : > { %p138_p1 = scmp.lt.s32.totalorder %s568_s12, 3 }
   0x4   : > { %p139_p2 = pnand %p474_p0, %p138_p1 }
   0x5   : > { %v190_v0 = vld [vmem:[%s674_s0] sm:$0xff] (!%p139_p2)  ;;  %v191_v1 = vld [vmem:[%s674_s0 + $0x8] sm:$0x3f] (!%p139_p2)  ;;  %vm248_vm0 = vcmask (!%p139_p2), 1045504   ;;  %s475_s18 = sshll.u32 (!%p139_p2), %s470_s13, 4  ;;  %vm570_vm1 = vmmov (!%p139_p2), 1  }
   0x6   : > { %142 = sbr.rel (%p139_p2) target bundleno = 247 (0xf7), region = 32  ;;  %v545_v2 = vpack.c.bf16 (!%p139_p2), %v191_v1, %v190_v0  ;;  %vm546_vm2 = vmpackc.low (!%p139_p2), %vm248_vm0, %vm570_vm1  ;;  %p163_p3 = scmp.lt.s32.totalorder (!%p139_p2), %s475_s18, 31  ;;  %vm199_vm3 = vcmask (!%p139_p2), 113664   ;;  %v479_v19 = vld [vmem:[%s675_s1] ss:$0 sm:$0xff] (!%p139_p2)  ;;  %vm397_vm4 = vcmask (!%p139_p2), 64512  }
   0x8   : > { %547 = vmatprep.subr.msk.bf16.mxu0 (!%p139_p2), %vm546_vm2, %v545_v2  ;;  %551 = vmatprep.subr.msk.bf16.mxu1 (!%p139_p2), %vm546_vm2, %v545_v2 }
   0x9   : > { %550 = vmatpush3.bf16.msk.msra.mxu0 (!%p139_p2), %vm546_vm2, %v545_v2  ;;  %552 = vmatpush3.bf16.msk.msra.mxu1 (!%p139_p2), %vm546_vm2, %v545_v2 }
   0xd   : > { %s679_s18 = smov (!%p163_p3, %s475_s18), 31 }
   0xe   : > { %s476_s19 = sshll.u32 %s679_s18, 3 }
   0xf   : > { %s166_s22 = scalar_lea.vmem %s676_s2, %s476_s19  ;;  %s637_s27 = scalar_lea.vmem %s677_s3, %s476_s19 }
  0x10   : > { %v174_v3 = vld [vmem:[%s166_s22] sm:$0xff]  ;;  %v175_v5 = vld [vmem:[%s166_s22 + $0x8] sm:$0xff]  ;;  %v176_v7 = vld [vmem:[%s166_s22 + $0x10] sm:$0xff] }
  0x11   : > { %v182_v4 = vld [vmem:[%s166_s22 + $0x40] sm:$0xff]  ;;  %521 = vmatprep.mubr.msk.f32.mxu0 %vm199_vm3, %v174_v3  ;;  %v183_v6 = vld [vmem:[%s166_s22 + $0x48] sm:$0xff]  ;;  %v184_v8 = vld [vmem:[%s166_s22 + $0x50] sm:$0xff] }
  0x12   : > { %533 = vmatprep.mubr.msk.f32.mxu1 %vm199_vm3, %v182_v4  ;;  %522 = vmatmul.mubr.msk.f32.vlgmr.msra.gmra.mrb[0].mxu0 %vm199_vm3, %v175_v5  ;;  %v177_v9 = vld [vmem:[%s166_s22 + $0x18] sm:$0xff]  ;;  %v178_v11 = vld [vmem:[%s166_s22 + $0x20] sm:$0xff]  ;;  %v179_v13 = vld [vmem:[%s166_s22 + $0x28] sm:$0xff] }
  0x13   : > { %534 = vmatmul.mubr.msk.f32.vlgmr.msra.gmra.mrb[0].mxu1 %vm199_vm3, %v183_v6  ;;  %524 = vmatprep.mubr.msk.f32.mxu0 %vm199_vm3, %v176_v7  ;;  %v185_v10 = vld [vmem:[%s166_s22 + $0x58] sm:$0xff]  ;;  %v186_v12 = vld [vmem:[%s166_s22 + $0x60] sm:$0xff]  ;;  %v187_v14 = vld [vmem:[%s166_s22 + $0x68] sm:$0xff] }
  0x14   : > { %536 = vmatprep.mubr.msk.f32.mxu1 %vm199_vm3, %v184_v8  ;;  %v180_v15 = vld [vmem:[%s166_s22 + $0x30] sm:$0xff]  ;;  %v181_v17 = vld [vmem:[%s166_s22 + $0x38] sm:$0xff] }
  0x15   : > { %v188_v16 = vld [vmem:[%s166_s22 + $0x70] sm:$0xff]  ;;  %v189_v18 = vld [vmem:[%s166_s22 + $0x78] sm:$0xff] }
  0x16   : > { %525 = vmatmul.mubr.msk.f32.gmra.mrb[2].mxu0 %vm199_vm3, %v177_v9 }
  0x17   : > { %537 = vmatmul.mubr.msk.f32.gmra.mrb[2].mxu1 %vm199_vm3, %v185_v10  ;;  %527 = vmatprep.mubr.msk.f32.mxu0 %vm199_vm3, %v178_v11 }
  0x18   : > { %539 = vmatprep.mubr.msk.f32.mxu1 %vm199_vm3, %v186_v12 }
  0x1a   : > { %528 = vmatmul.mubr.msk.f32.gmra.mrb[4].mxu0 %vm199_vm3, %v179_v13 }
  0x1b   : > { %540 = vmatmul.mubr.msk.f32.gmra.mrb[4].mxu1 %vm199_vm3, %v187_v14  ;;  %530 = vmatprep.mubr.msk.f32.mxu0 %vm199_vm3, %v180_v15 }
  0x1c   : > { %542 = vmatprep.mubr.msk.f32.mxu1 %vm199_vm3, %v188_v16 }
  0x1e   : > { %531 = vmatmul.mubr.msk.f32.gmra.mrb[6].mxu0 %vm199_vm3, %v181_v17 }
  0x1f   : > { %543 = vmatmul.mubr.msk.f32.gmra.mrb[6].mxu1 %vm199_vm3, %v189_v18 }
  0xe5   : > { %v523_v20 = vpop.f32.mrb[0].mxu0 }
  0xe6   : > { %v535_v21 = vpop.f32.mrb[0].mxu1  ;;  %v324_v22 = vadd.f32 %v523_v20, %v479_v19  ;;  %v318_v24 = vpop.f32.mrb[1].mxu0 }
  0xe7   : > { %v364_v23 = vadd.f32 %v535_v21, %v479_v19  ;;  %v358_v25 = vpop.f32.mrb[1].mxu1  ;;  %v319_v26 = vadd.f32 %v479_v19, %v318_v24 }
  0xe8   : > { %v359_v27 = vadd.f32 %v479_v19, %v358_v25  ;;  %399 = vst.msk [vmem:[%s637_s27 + $0x8] sm:$0xff] %vm397_vm4, %v324_v22 }
  0xe9   : > { %407 = vst.msk [vmem:[%s637_s27 + $0x48] sm:$0xff] %vm397_vm4, %v364_v23  ;;  %398 = vst.msk [vmem:[%s637_s27] sm:$0xff] %vm397_vm4, %v319_v26  ;;  %v526_v28 = vpop.f32.mrb[2].mxu0 }
  0xea   : > { %406 = vst.msk [vmem:[%s637_s27 + $0x40] sm:$0xff] %vm397_vm4, %v359_v27  ;;  %v538_v29 = vpop.f32.mrb[2].mxu1  ;;  %v334_v30 = vadd.f32 %v526_v28, %v479_v19  ;;  %v328_v32 = vpop.f32.mrb[3].mxu0 }
  0xeb   : > { %v374_v31 = vadd.f32 %v538_v29, %v479_v19  ;;  %v368_v33 = vpop.f32.mrb[3].mxu1  ;;  %v329_v34 = vadd.f32 %v479_v19, %v328_v32 }
  0xec   : > { %v369_v35 = vadd.f32 %v479_v19, %v368_v33  ;;  %401 = vst.msk [vmem:[%s637_s27 + $0x18] sm:$0xff] %vm397_vm4, %v334_v30 }
  0xed   : > { %409 = vst.msk [vmem:[%s637_s27 + $0x58] sm:$0xff] %vm397_vm4, %v374_v31  ;;  %400 = vst.msk [vmem:[%s637_s27 + $0x10] sm:$0xff] %vm397_vm4, %v329_v34  ;;  %v529_v36 = vpop.f32.mrb[4].mxu0 }
  0xee   : > { %408 = vst.msk [vmem:[%s637_s27 + $0x50] sm:$0xff] %vm397_vm4, %v369_v35  ;;  %v541_v37 = vpop.f32.mrb[4].mxu1  ;;  %v344_v38 = vadd.f32 %v529_v36, %v479_v19  ;;  %v338_v40 = vpop.f32.mrb[5].mxu0 }
  0xef   : > { %v384_v39 = vadd.f32 %v541_v37, %v479_v19  ;;  %v378_v41 = vpop.f32.mrb[5].mxu1  ;;  %v339_v42 = vadd.f32 %v479_v19, %v338_v40 }
  0xf0   : > { %v379_v43 = vadd.f32 %v479_v19, %v378_v41  ;;  %403 = vst.msk [vmem:[%s637_s27 + $0x28] sm:$0xff] %vm397_vm4, %v344_v38 }
  0xf1   : > { %411 = vst.msk [vmem:[%s637_s27 + $0x68] sm:$0xff] %vm397_vm4, %v384_v39  ;;  %402 = vst.msk [vmem:[%s637_s27 + $0x20] sm:$0xff] %vm397_vm4, %v339_v42  ;;  %v532_v44 = vpop.f32.mrb[6].mxu0 }
  0xf2   : > { %410 = vst.msk [vmem:[%s637_s27 + $0x60] sm:$0xff] %vm397_vm4, %v379_v43  ;;  %v544_v45 = vpop.f32.mrb[6].mxu1  ;;  %v354_v46 = vadd.f32 %v532_v44, %v479_v19  ;;  %v348_v48 = vpop.f32.mrb[7].mxu0 }
  0xf3   : > { %v394_v47 = vadd.f32 %v544_v45, %v479_v19  ;;  %v388_v49 = vpop.f32.mrb[7].mxu1  ;;  %v349_v50 = vadd.f32 %v479_v19, %v348_v48 }
  0xf4   : > { %v389_v51 = vadd.f32 %v479_v19, %v388_v49  ;;  %405 = vst.msk [vmem:[%s637_s27 + $0x38] sm:$0xff] %vm397_vm4, %v354_v46 }
  0xf5   : > { %413 = vst.msk [vmem:[%s637_s27 + $0x78] sm:$0xff] %vm397_vm4, %v394_v47  ;;  %404 = vst.msk [vmem:[%s637_s27 + $0x30] sm:$0xff] %vm397_vm4, %v349_v50 }
  0xf6   : > { %412 = vst.msk [vmem:[%s637_s27 + $0x70] sm:$0xff] %vm397_vm4, %v389_v51 }
  0xf7 PF: > { %s13_s12 = sadd.s32 1, %s568_s12  }
  0xf8   : > { %p10_p4 = scmp.ge.s32.totalorder %s13_s12, 4  }
  0xfa   :  { %12 = sbr.rel (!%p10_p4) target bundleno = 1 (0x1), region = 62 }

</bundles_post_ra>
